<compile_context>
chip_gen: v7x
topology: tpu7x:2x2x1
jax: 0.10.0
libtpu: 0.0.40
codegen_flags: <defaults>
</compile_context>

<pallas_src>
import jax
import jax.numpy as jnp
from jax.experimental import pallas as pl
from jax.experimental.pallas import tpu as pltpu


# ----------------------------------------------------------------------------
# Generation-aware VMEM budgeting
# ----------------------------------------------------------------------------
def _detect_vmem_capacity():
    try:
        info = pltpu.get_tpu_info()
        cap = getattr(info, "vmem_capacity_bytes", None)
        if cap:
            return int(cap)
    except Exception:
        pass
    return 64 * 1024 * 1024  # v7x-sized fallback; safe on every generation


_VMEM_CAPACITY = _detect_vmem_capacity()
_VMEM_LIMIT = int(_VMEM_CAPACITY * 0.75)        # scoped limit handed to Mosaic
_VMEM_TILE_BUDGET = int(_VMEM_CAPACITY * 0.30)  # target resident pipeline bytes
_MAX_ROW_TILE = 2048                            # sanity ceiling; budget usually binds first


def _round_down(x, mult):
    return max(mult, (x // mult) * mult)


def _choose_row_tile(m, per_row_bytes, fixed_bytes=0, row_multiple=8):
    """Largest row tile (multiple of `row_multiple`) whose resident footprint
    stays inside the generation-aware VMEM budget; split into >=2 grid steps
    when the whole weight would otherwise be one tile (v7x megacore)."""
    if m <= row_multiple:
        return m
    avail = max(0, _VMEM_TILE_BUDGET - fixed_bytes)
    max_rows = max(row_multiple, avail // max(1, per_row_bytes))
    tm = min(m, _MAX_ROW_TILE, max_rows)
    if tm >= m:
        if m >= 2 * row_multiple:
            tm = pl.cdiv(m, 2)  # give the "parallel" axis at least 2 steps
        else:
            return m
    return _round_down(tm, row_multiple)


def _lane_dense_view(total):
    """(padded_total, rows, cols) for a flattened lane-dense 2-D view; cols is
    a multiple of 128 so stores lower to unmasked full-lane vst."""
    padded = pl.cdiv(total, 1024) * 1024  # multiple of 8*128
    cols = 128
    for cand in (4096, 2048, 1024, 512, 256, 128):
        if padded % cand == 0 and padded // cand >= 8:
            cols = cand
            break
    return padded, padded // cols, cols


# ----------------------------------------------------------------------------
# Kernel 1: theta_avg for 2-D weights:  avg = base + coeff * sum_k tv_k
#   - row-tiled, K task vectors as separate refs (no (K,M,N) stack)
#   - optional second output: the raw task-vector sum (reused by the SVD shift)
# ----------------------------------------------------------------------------
def _make_merge_avg_kernel(num_tasks, coeff, return_sum):
    def kernel(base_ref, *rest):
        tv_refs = rest[:num_tasks]
        out_refs = rest[num_tasks:]
        total = tv_refs[0][...]
        for tref in tv_refs[1:]:
            total = total + tref[...]
        out_refs[0][...] = base_ref[...] + coeff * total
        if return_sum:
            out_refs[1][...] = total
    return kernel


def merge_weight_avg(base, tvs, coeff, return_sum=False):
    """base: (M, N); tvs: list of K (M, N). Returns base + coeff*sum
    (and optionally the raw sum)."""
    M, N = base.shape
    K = len(tvs)

    # Lane-dense flattening when the natural last dim is not a 128 multiple.
    remap = (N % 128) != 0
    if remap:
        total_elems = M * N
        padded, R, C = _lane_dense_view(total_elems)
        pad = padded - total_elems

        def to_view(x):
            flat = x.reshape(-1)
            if pad:
                flat = jnp.concatenate([flat, jnp.zeros((pad,), x.dtype)])
            return flat.reshape(R, C)

        base_v = to_view(base)
        tvs_v = [to_view(t) for t in tvs]
    else:
        R, C = M, N
        base_v, tvs_v = base, tvs

    n_out = 2 if return_sum else 1
    per_row = 2 * (K + 1 + n_out) * C * 4  # double-buffered f32 streams
    TM = _choose_row_tile(R, per_row)
    row_spec = pl.BlockSpec((TM, C), lambda i: (i, 0))

    if return_sum:
        out_shape = (jax.ShapeDtypeStruct((R, C), base.dtype),
                     jax.ShapeDtypeStruct((R, C), base.dtype))
        out_specs = [row_spec, row_spec]
    else:
        out_shape = jax.ShapeDtypeStruct((R, C), base.dtype)
        out_specs = row_spec

    outs = pl.pallas_call(
        _make_merge_avg_kernel(K, float(coeff), return_sum),
        out_shape=out_shape,
        grid_spec=pltpu.PrefetchScalarGridSpec(
            num_scalar_prefetch=0,
            grid=(pl.cdiv(R, TM),),
            in_specs=[row_spec] * (K + 1),
            out_specs=out_specs,
        ),
        compiler_params=pltpu.CompilerParams(
            dimension_semantics=("parallel",),
            vmem_limit_bytes=_VMEM_LIMIT,
        ),
    )(base_v, *tvs_v)

    def from_view(x2):
        if not remap:
            return x2
        return x2.reshape(-1)[: M * N].reshape(M, N)

    if return_sum:
        avg_v, sum_v = outs
        return from_view(avg_v), from_view(sum_v)
    return from_view(outs)


# ----------------------------------------------------------------------------
# Kernel 2: fused low-rank reconstruction + final merge (SVD keys)
#   merged = theta_avg + U_cat @ SVT_cat
#   U_cat   (M, K*r_pad) bf16, row-tiled
#   SVT_cat (K*r_pad, N) bf16, VMEM-resident (prior & s pre-folded in wrapper)
# ----------------------------------------------------------------------------
def _fused_lowrank_merge_kernel(theta_ref, u_ref, svt_ref, out_ref):
    recon = jnp.dot(u_ref[...], svt_ref[...], preferred_element_type=jnp.float32)
    out_ref[...] = (theta_ref[...] + recon).astype(out_ref.dtype)


def fused_lowrank_merge(theta, u_cat_bf16, svt_cat_bf16):
    """theta: (M, N) f32; u_cat: (M, KRp) bf16; svt_cat: (KRp, N) bf16."""
    M, N = theta.shape
    KRp = u_cat_bf16.shape[1]
    # theta/out f32 and U bf16 streams double-buffered; SVT stack resident
    # (counted x2 conservatively for the buffer pair even though it never
    # changes across row tiles).
    per_row = 2 * (4 * N + 2 * KRp + 4 * N)
    fixed = 2 * KRp * N * 2
    TM = _choose_row_tile(M, per_row, fixed, row_multiple=16)  # bf16 row-tiled operand
    row_spec = pl.BlockSpec((TM, N), lambda i: (i, 0))
    return pl.pallas_call(
        _fused_lowrank_merge_kernel,
        out_shape=jax.ShapeDtypeStruct((M, N), theta.dtype),
        grid_spec=pltpu.PrefetchScalarGridSpec(
            num_scalar_prefetch=0,
            grid=(pl.cdiv(M, TM),),
            in_specs=[
                row_spec,                                      # theta_avg tile (f32)
                pl.BlockSpec((TM, KRp), lambda i: (i, 0)),     # U_cat tile (bf16)
                pl.BlockSpec((KRp, N), lambda i: (0, 0)),      # SVT_cat, resident
            ],
            out_specs=row_spec,
        ),
        compiler_params=pltpu.CompilerParams(
            dimension_semantics=("parallel",),
            vmem_limit_bytes=_VMEM_LIMIT,
        ),
    )(theta, u_cat_bf16, svt_cat_bf16)


# ----------------------------------------------------------------------------
# CART merge driver (matches StaticMergeModule._merge_weights('CART'))
# ----------------------------------------------------------------------------
def _is_svd_key(key):
    return ('attn' in key or 'mlp' in key) and not ('ln' in key or 'bias' in key)


def cart_merge(pretrained, task_vectors, rank_ratio, prior):
    num_tasks = len(task_vectors)
    avg_coeff = 1.0 / num_tasks
    keys = list(pretrained.keys())

    # theta_avg = pretrained + (1/T) * sum_k tv_k
    #   2-D weights -> lane-dense row-tiled Pallas kernel (SVD keys also emit
    #   the raw task-vector sum for the origin shift); 1-D params -> plain jnp.
    theta_avg = {}
    tv_sum_2d = {}
    for key in keys:
        base = pretrained[key]
        tvs = [tv[key] for tv in task_vectors]
        if base.ndim == 2:
            if _is_svd_key(key):
                theta_avg[key], tv_sum_2d[key] = merge_weight_avg(
                    base, tvs, avg_coeff, return_sum=True)
            else:
                theta_avg[key] = merge_weight_avg(base, tvs, avg_coeff)
        else:
            total = tvs[0]
            for t in tvs[1:]:
                total = total + t
            theta_avg[key] = base + avg_coeff * total

    merged = {}
    for key in keys:
        base = pretrained[key]
        if _is_svd_key(key) and base.ndim == 2:
            M, N = base.shape
            r = max(1, int(rank_ratio * min(M, N)))
            # Origin shift: tv_k + pre - theta_avg == tv_k - avg_coeff * sum_j tv_j
            tv_stack = jnp.stack([tv[key] for tv in task_vectors], axis=0)
            shifted = tv_stack - avg_coeff * tv_sum_2d[key][None]
            # TODO(synk): SVD has no clean Pallas equivalent; batched jnp.linalg.svd (XLA).
            U, s_vals, VT = jnp.linalg.svd(shifted, full_matrices=False)
            U_r = U[:, :, :r]                                        # (K, M, r)
            sVT = (prior * s_vals[:, :r])[:, :, None] * VT[:, :r, :]  # (K, r, N)
            KR = num_tasks * r
            KRp = pl.cdiv(KR, 128) * 128   # aligned MXU contraction tiles
            u_cat = jnp.transpose(U_r, (1, 0, 2)).reshape(M, KR)
            svt_cat = sVT.reshape(KR, N)
            if KRp != KR:
                u_cat = jnp.pad(u_cat, ((0, 0), (0, KRp - KR)))
                svt_cat = jnp.pad(svt_cat, ((0, KRp - KR), (0, 0)))
            merged[key] = fused_lowrank_merge(
                theta_avg[key],
                u_cat.astype(jnp.bfloat16),
                svt_cat.astype(jnp.bfloat16),
            )
        else:
            # sum_k (tv_k + pre - theta_avg) == 0 exactly since
            # theta_avg = pre + avg_coeff * sum_k tv_k, so the non-SVD
            # contribution vanishes and merged == theta_avg.
            merged[key] = theta_avg[key]
    return merged


# Pure-JAX reference for correctness checking
def cart_merge_ref(pretrained, task_vectors, rank_ratio, prior):
    n = len(task_vectors)
    theta_avg = {k: pretrained[k] + (1.0 / n) * sum(tv[k] for tv in task_vectors)
                 for k in pretrained}
    total = {k: jnp.zeros_like(pretrained[k]) for k in pretrained}
    for tv in task_vectors:
        for k in pretrained:
            shifted = tv[k] + pretrained[k] - theta_avg[k]
            if _is_svd_key(k) and tv[k].ndim == 2:
                U, s, VT = jnp.linalg.svd(shifted, full_matrices=False)
                r = max(1, int(rank_ratio * s.shape[0]))
                recon = (U[:, :r] * s[:r]) @ VT[:r, :]
                total[k] = total[k] + recon
            else:
                total[k] = total[k] + shifted
    return {k: theta_avg[k] + prior * total[k] for k in pretrained}


# ----------------------------------------------------------------------------
if __name__ == "__main__":
    key = jax.random.PRNGKey(0)

    # Synthetic "ImageEncoder" state dict + task vectors (deterministic init).
    shapes = {
        "visual.resblocks.0.attn.in_proj_weight": (32, 64),
        "visual.resblocks.0.mlp.c_fc.weight": (64, 32),
        "visual.resblocks.0.mlp.c_fc.bias": (64,),
        "visual.resblocks.0.ln_1.weight": (32,),
    }
    num_tasks = 3
    rank_ratio = 0.5
    prior = 0.3

    keys_iter = jax.random.split(key, (num_tasks + 1) * len(shapes))
    it = iter(keys_iter)
    pretrained = {k: 0.05 * jax.random.normal(next(it), s, dtype=jnp.float32)
                  for k, s in shapes.items()}
    task_vectors = [
        {k: 0.02 * jax.random.normal(next(it), s, dtype=jnp.float32)
         for k, s in shapes.items()}
        for _ in range(num_tasks)
    ]

    merged = cart_merge(pretrained, task_vectors, rank_ratio, prior)
    merged = jax.tree_util.tree_map(jax.block_until_ready, merged)

    ref = cart_merge_ref(pretrained, task_vectors, rank_ratio, prior)
    for k in shapes:
        assert merged[k].shape == pretrained[k].shape
        assert jnp.allclose(merged[k], ref[k], atol=1e-3, rtol=1e-3), k

    print("KERNEL_OK")
</pallas_src>

<mosaic_0001>
module attributes {stable_mosaic.version = 11 : i64} {
  func.func @kernel(%arg0: i32, %arg1: memref<8x256xf32, #tpu.memory_space<vmem>>, %arg2: memref<8x256xf32, #tpu.memory_space<vmem>>, %arg3: memref<8x256xf32, #tpu.memory_space<vmem>>, %arg4: memref<8x256xf32, #tpu.memory_space<vmem>>, %arg5: memref<8x256xf32, #tpu.memory_space<vmem>>, %arg6: memref<8x256xf32, #tpu.memory_space<vmem>>) attributes {dimension_semantics = [#tpu.dimension_semantics<parallel>], iteration_bounds = array<i64: 1>, scalar_prefetch = 0 : i64, scratch_operands = 0 : i64, tpu.core_type = #tpu.core_type<tc>, window_params = [{transform_indices = @transform_0, window_bounds = array<i64: 8, 256>}, {transform_indices = @transform_1, window_bounds = array<i64: 8, 256>}, {transform_indices = @transform_2, window_bounds = array<i64: 8, 256>}, {transform_indices = @transform_3, window_bounds = array<i64: 8, 256>}, {transform_indices = @transform_4, window_bounds = array<i64: 8, 256>}, {transform_indices = @transform_5, window_bounds = array<i64: 8, 256>}]} {
    %c0 = arith.constant 0 : index
    %c0_0 = arith.constant 0 : index
    %0 = vector.load %arg2[%c0, %c0_0] : memref<8x256xf32, #tpu.memory_space<vmem>>, vector<8x256xf32>
    %c0_1 = arith.constant 0 : index
    %c0_2 = arith.constant 0 : index
    %1 = vector.load %arg3[%c0_1, %c0_2] : memref<8x256xf32, #tpu.memory_space<vmem>>, vector<8x256xf32>
    %2 = arith.addf %0, %1 : vector<8x256xf32>
    %c0_3 = arith.constant 0 : index
    %c0_4 = arith.constant 0 : index
    %3 = vector.load %arg4[%c0_3, %c0_4] : memref<8x256xf32, #tpu.memory_space<vmem>>, vector<8x256xf32>
    %4 = arith.addf %2, %3 : vector<8x256xf32>
    %c0_5 = arith.constant 0 : index
    %c0_6 = arith.constant 0 : index
    %5 = vector.load %arg1[%c0_5, %c0_6] : memref<8x256xf32, #tpu.memory_space<vmem>>, vector<8x256xf32>
    %cst = arith.constant 0.333333343 : f32
    %6 = vector.broadcast %cst : f32 to vector<8x256xf32>
    %7 = arith.mulf %6, %4 : vector<8x256xf32>
    %8 = arith.addf %5, %7 : vector<8x256xf32>
    %c0_7 = arith.constant 0 : index
    %c0_8 = arith.constant 0 : index
    %9 = vector.load %arg5[%c0_7, %c0_8] : memref<8x256xf32, #tpu.memory_space<vmem>>, vector<8x256xf32>
    tpu.vector_store %arg5[%c0_7, %c0_8], %8 {strides = array<i32>} : memref<8x256xf32, #tpu.memory_space<vmem>>, vector<8x256xf32>,
    %c0_9 = arith.constant 0 : index
    %c0_10 = arith.constant 0 : index
    %10 = vector.load %arg6[%c0_9, %c0_10] : memref<8x256xf32, #tpu.memory_space<vmem>>, vector<8x256xf32>
    tpu.vector_store %arg6[%c0_9, %c0_10], %4 {strides = array<i32>} : memref<8x256xf32, #tpu.memory_space<vmem>>, vector<8x256xf32>,
    return
  }
  func.func @transform_0(%arg0: i32) -> (i32, i32) {
    %c0_i32 = arith.constant 0 : i32
    %c0_i32_0 = arith.constant 0 : i32
    return %arg0, %c0_i32 : i32, i32
  }
  func.func @transform_1(%arg0: i32) -> (i32, i32) {
    %c0_i32 = arith.constant 0 : i32
    %c0_i32_0 = arith.constant 0 : i32
    return %arg0, %c0_i32 : i32, i32
  }
  func.func @transform_2(%arg0: i32) -> (i32, i32) {
    %c0_i32 = arith.constant 0 : i32
    %c0_i32_0 = arith.constant 0 : i32
    return %arg0, %c0_i32 : i32, i32
  }
  func.func @transform_3(%arg0: i32) -> (i32, i32) {
    %c0_i32 = arith.constant 0 : i32
    %c0_i32_0 = arith.constant 0 : i32
    return %arg0, %c0_i32 : i32, i32
  }
  func.func @transform_4(%arg0: i32) -> (i32, i32) {
    %c0_i32 = arith.constant 0 : i32
    %c0_i32_0 = arith.constant 0 : i32
    return %arg0, %c0_i32 : i32, i32
  }
  func.func @transform_5(%arg0: i32) -> (i32, i32) {
    %c0_i32 = arith.constant 0 : i32
    %c0_i32_0 = arith.constant 0 : i32
    return %arg0, %c0_i32 : i32, i32
  }
}

</mosaic_0001>

<bundles_post_ra>
// kernel: tpu_custom_call.1
= control target key start
LH: loop header
LB: loop body
LE: loop exit
PB: predicated region body
PF: predicated region fallthrough
CT: control target
= control target key end

     0   :  { %11 = vsyncpa [#allocation3], 0  ;;  %s375_s0 = inlined_call_operand.hbm [shape: f32[8,256], index: 0, kind: input, shape index: {}]   ;;  %s376_s1 = inlined_call_operand.hbm [shape: f32[8,256], index: 1, kind: input, shape index: {}]   ;;  %s377_s2 = inlined_call_operand.hbm [shape: f32[8,256], index: 2, kind: input, shape index: {}]   ;;  %s378_s3 = inlined_call_operand.hbm [shape: f32[8,256], index: 3, kind: input, shape index: {}]   ;;  %s379_s4 = inlined_call_operand.hbm [shape: f32[8,256], index: 4, kind: output, shape index: {0}]   ;;  %s380_s5 = inlined_call_operand.hbm [shape: f32[8,256], index: 5, kind: output, shape index: {1}]  }
   0x1   :  { %12 = vsyncpa [#allocation6], 0 }
   0x2   :  { %13 = vsyncpa [#allocation9], 0 }
   0x3   :  { %14 = vsyncpa [#allocation4], 0 }
   0x4   :  { %15 = vsyncpa [#allocation12], 0  ;;  %s267_s18 = smov [#allocation5]   ;;  %s268_s20 = smov [#allocation2]  }
   0x5   :  { %s32_s19 = sshll.u32 %s267_s18, 4  ;;  %s22_s21 = sshll.u32 %s268_s20, 4  ;;  %s33_s19 = int_to_ptr.vmem [resolvable:$true] %s32_s19  ;;  %s23_s21 = int_to_ptr.vmem [resolvable:$true] %s22_s21 }
   0x6   :  { %s125_s24 = scalar_lea.hbm %s376_s1, 256 }
   0x7   :  { %p126_p0 = scmp.ne.s32.totalorder %s376_s1, %s125_s24  ;;  %p129_p1 = scmp.lt.u32.totalorder %s125_s24, %s376_s1 }
   0x9   :  { %p131_p2 = pnand %p129_p1, %p126_p0 }
   0xb   :  { %134 = shalt.err (!%p131_p2)
}
   0xc   :  { %s135_s29 = scalar_lea.vmem %s33_s19, 256  ;;  %p140_p4 = scmp.lt.s32.totalorder %s33_s19, %s33_s19 }
   0xd   :  { %p136_p3 = scmp.ne.s32.totalorder %s33_s19, %s135_s29  ;;  %p141_p5 = scmp.lt.s32.totalorder %s135_s29, %s135_s29 }
   0xf   :  { %p142_p6 = por %p141_p5, %p140_p4 }
  0x11   :  { %p143_p7 = pnand %p142_p6, %p136_p3 }
  0x13   :  { %146 = shalt.err (!%p143_p7)
}
  0x14   :  { %35 = dma.hbm_to_vmem [thread:$0]  %s376_s1, 256, %s33_s19, [#allocation6]  }
  0x15   :  { %s147_s9 = scalar_lea.hbm %s375_s0, 256 }
  0x16   :  { %p148_p8 = scmp.ne.s32.totalorder %s375_s0, %s147_s9  ;;  %p151_p9 = scmp.lt.u32.totalorder %s147_s9, %s375_s0 }
  0x18   :  { %p153_p10 = pnand %p151_p9, %p148_p8 }
  0x1a   :  { %156 = shalt.err (!%p153_p10)
}
  0x1b   :  { %s157_s14 = scalar_lea.vmem %s23_s21, 256  ;;  %p162_p12 = scmp.lt.s32.totalorder %s23_s21, %s23_s21 }
  0x1c   :  { %p158_p11 = scmp.ne.s32.totalorder %s23_s21, %s157_s14  ;;  %p163_p13 = scmp.lt.s32.totalorder %s157_s14, %s157_s14 }
  0x1e   :  { %p164_p0 = por %p163_p13, %p162_p12 }
  0x20   :  { %p165_p1 = pnand %p164_p0, %p158_p11 }
  0x22   :  { %168 = shalt.err (!%p165_p1)
}
  0x23   :  { %25 = dma.hbm_to_vmem [thread:$0]  %s375_s0, 256, %s23_s21, [#allocation3]  }
  0x24   :  { %s269_s16 = smov [#allocation7]   ;;  %s270_s18 = smov [#allocation8]  }
  0x25   :  { %s42_s17 = sshll.u32 %s269_s16, 4  ;;  %s52_s19 = sshll.u32 %s270_s18, 4  ;;  %s43_s17 = int_to_ptr.vmem [resolvable:$true] %s42_s17  ;;  %s53_s19 = int_to_ptr.vmem [resolvable:$true] %s52_s19 }
  0x26   :  { %s169_s23 = scalar_lea.hbm %s377_s2, 256 }
  0x27   :  { %p170_p2 = scmp.ne.s32.totalorder %s377_s2, %s169_s23  ;;  %p173_p3 = scmp.lt.u32.totalorder %s169_s23, %s377_s2 }
  0x29   :  { %p175_p4 = pnand %p173_p3, %p170_p2 }
  0x2b   :  { %178 = shalt.err (!%p175_p4)
}
  0x2c   :  { %s179_s0 = scalar_lea.vmem %s43_s17, 256  ;;  %p184_p6 = scmp.lt.s32.totalorder %s43_s17, %s43_s17 }
  0x2d   :  { %p180_p5 = scmp.ne.s32.totalorder %s43_s17, %s179_s0  ;;  %p185_p7 = scmp.lt.s32.totalorder %s179_s0, %s179_s0 }
  0x2f   :  { %p186_p8 = por %p185_p7, %p184_p6 }
  0x31   :  { %p187_p9 = pnand %p186_p8, %p180_p5 }
  0x33   :  { %190 = shalt.err (!%p187_p9)
}
  0x34   :  { %45 = dma.hbm_to_vmem [thread:$0]  %s377_s2, 256, %s43_s17, [#allocation6]  }
  0x35   :  { %s191_s6 = scalar_lea.hbm %s378_s3, 256 }
  0x36   :  { %p192_p10 = scmp.ne.s32.totalorder %s378_s3, %s191_s6  ;;  %p195_p11 = scmp.lt.u32.totalorder %s191_s6, %s378_s3 }
  0x38   :  { %p197_p12 = pnand %p195_p11, %p192_p10 }
  0x3a   :  { %200 = shalt.err (!%p197_p12)
}
  0x3b   :  { %s201_s11 = scalar_lea.vmem %s53_s19, 256  ;;  %p206_p0 = scmp.lt.s32.totalorder %s53_s19, %s53_s19 }
  0x3c   :  { %p202_p13 = scmp.ne.s32.totalorder %s53_s19, %s201_s11  ;;  %p207_p1 = scmp.lt.s32.totalorder %s201_s11, %s201_s11 }
  0x3e   :  { %p208_p2 = por %p207_p1, %p206_p0 }
  0x40   :  { %p209_p3 = pnand %p208_p2, %p202_p13 }
  0x42   :  { %212 = shalt.err (!%p209_p3)
}
  0x43   :  { %55 = dma.hbm_to_vmem [thread:$0]  %s378_s3, 256, %s53_s19, [#allocation9]  }
  0x44   :  { %257 = dma.done.wait [#allocation3], 256  }
  0x45   :  { %258 = vsyncadd [#allocation3], 4294967040 }
  0x46   :  { %259 = dma.done.wait [#allocation6], 512  }
  0x47   :  { %260 = vsyncadd [#allocation6], 4294966784 }
  0x48   :  { %261 = dma.done.wait [#allocation9], 256  }
  0x49   :  { %262 = vsyncadd [#allocation9], 4294967040  ;;  %v68_v0 = vld [vmem:[#allocation5] sm:$0xff]  ;;  %v70_v1 = vld [vmem:[#allocation7] sm:$0xff]  ;;  %s271_s13 = smov [#allocation11]   ;;  %s272_s3 = smov [#allocation10]  }
  0x4a   :  { %v74_v2 = vld [vmem:[#allocation8] sm:$0xff]  ;;  %v72_v3 = vadd.f32 %v70_v1, %v68_v0  ;;  %v69_v4 = vld [vmem:[#allocation5 + $0x8] sm:$0xff]  ;;  %v71_v5 = vld [vmem:[#allocation7 + $0x8] sm:$0xff]  ;;  %s104_s14 = sshll.u32 %s271_s13, 4  ;;  %s94_s1 = sshll.u32 %s272_s3, 4  ;;  %s105_s14 = int_to_ptr.vmem [resolvable:$true] %s104_s14  ;;  %s95_s1 = int_to_ptr.vmem [resolvable:$true] %s94_s1 }
  0x4b   :  { %v73_v6 = vadd.f32 %v71_v5, %v69_v4  ;;  %v75_v7 = vld [vmem:[#allocation8 + $0x8] sm:$0xff]  ;;  %v78_v9 = vld [vmem:[#allocation2] sm:$0xff]  ;;  %v79_v12 = vld [vmem:[#allocation2 + $0x8] sm:$0xff]  ;;  %s213_s15 = scalar_lea.vmem %s105_s14, 256  ;;  %p218_p5 = scmp.lt.s32.totalorder %s105_s14, %s105_s14 }
  0x4c   :  { %v76_v8 = vadd.f32 %v74_v2, %v72_v3  ;;  %p214_p4 = scmp.ne.s32.totalorder %s105_s14, %s213_s15  ;;  %p219_p6 = scmp.lt.s32.totalorder %s213_s15, %s213_s15 }
  0x4d   :  { %v77_v10 = vadd.f32 %v75_v7, %v73_v6 }
  0x4e   :  { %v80_v11 = vmul.f32 0.33333334, %v76_v8  ;;  %86 = vst [vmem:[#allocation11] sm:$0xff] %v76_v8  ;;  %p220_p7 = por %p219_p6, %p218_p5 }
  0x4f   :  { %v81_v13 = vmul.f32 0.33333334, %v77_v10  ;;  %87 = vst [vmem:[#allocation11 + $0x8] sm:$0xff] %v77_v10 }
  0x50   :  { %v82_v14 = vadd.f32 %v80_v11, %v78_v9  ;;  %p221_p8 = pnand %p220_p7, %p214_p4 }
  0x52   :  { %224 = shalt.err (!%p221_p8)
}
  0x53   :  { %s225_s18 = scalar_lea.hbm %s380_s5, 256 }
  0x54   :  { %p226_p9 = scmp.ne.s32.totalorder %s380_s5, %s225_s18  ;;  %p229_p10 = scmp.lt.u32.totalorder %s225_s18, %s380_s5 }
  0x56   :  { %p231_p11 = pnand %p229_p10, %p226_p9 }
  0x58   :  { %234 = shalt.err (!%p231_p11)
}
  0x59   :  { %107 = dma.vmem_to_hbm [thread:$0]  %s105_s14, 256, %s380_s5, [#allocation12]   ;;  %v83_v15 = vadd.f32 %v81_v13, %v79_v12  ;;  %84 = vst [vmem:[#allocation10] sm:$0xff] %v82_v14 }
  0x5a   :  { %s235_s26 = scalar_lea.vmem %s95_s1, 256  ;;  %p240_p13 = scmp.lt.s32.totalorder %s95_s1, %s95_s1 }
  0x5b   :  { %85 = vst [vmem:[#allocation10 + $0x8] sm:$0xff] %v83_v15  ;;  %p236_p12 = scmp.ne.s32.totalorder %s95_s1, %s235_s26  ;;  %p241_p0 = scmp.lt.s32.totalorder %s235_s26, %s235_s26 }
  0x5d   :  { %p242_p1 = por %p241_p0, %p240_p13 }
  0x5f   :  { %p243_p2 = pnand %p242_p1, %p236_p12 }
  0x61   :  { %246 = shalt.err (!%p243_p2)
}
  0x62   :  { %s247_s21 = scalar_lea.hbm %s379_s4, 256 }
  0x63   :  { %p248_p3 = scmp.ne.s32.totalorder %s379_s4, %s247_s21  ;;  %p251_p4 = scmp.lt.u32.totalorder %s247_s21, %s379_s4 }
  0x65   :  { %p253_p5 = pnand %p251_p4, %p248_p3 }
  0x67   :  { %256 = shalt.err (!%p253_p5)
}
  0x68   :  { %97 = dma.vmem_to_hbm [thread:$0]  %s95_s1, 256, %s379_s4, [#allocation4]  }
  0x69   :  { %263 = dma.done.wait [#allocation4], 256  }
  0x6a   :  { %264 = vsyncadd [#allocation4], 4294967040 }
  0x6b   :  { %265 = dma.done.wait [#allocation12], 256  }
  0x6c   :  { %266 = vsyncadd [#allocation12], 4294967040 }
  0x6d   :  { %114 = vsyncpa [#allocation3], 1 }
  0x6e   :  { %115 = vsyncpa [#allocation6], 1 }
  0x6f   :  { %116 = vsyncpa [#allocation9], 1 }
  0x70   :  { %117 = vsyncpa [#allocation4], 1 }
  0x71   :  { %118 = vsyncpa [#allocation12], 1 }

</bundles_post_ra>
